<compile_context>
chip_gen: v5e
topology: v5e:2x2
jax: 0.10.0
libtpu: 0.0.40
codegen_flags: <defaults>
</compile_context>

<pallas_src>
import functools

import jax
import jax.numpy as jnp
from jax.experimental import pallas as pl
from jax.experimental.pallas import tpu as pltpu


# ----------------------------------------------------------------------------
# Tiling helpers
# ----------------------------------------------------------------------------

_TM_MAX = 512  # upper bound on the M tile; also used when budgeting tk


def _round_up(x, m):
    return ((x + m - 1) // m) * m


@functools.lru_cache(maxsize=None)
def _vmem_capacity_bytes():
    """Per-core VMEM capacity (128 MiB on v5e/v6e, 64 MiB on v7x)."""
    try:
        return int(pltpu.get_tpu_info().vmem_capacity_bytes)
    except Exception:
        return 64 * 1024 * 1024  # conservative fallback (v7x per-core)


def _tile_budget_bytes():
    # ~3/8 of per-core VMEM: ~48 MiB on v5e/v6e, ~24 MiB on v7x.
    return (3 * _vmem_capacity_bytes()) // 8


def _row_align(compute_dtype):
    itemsize = jnp.dtype(compute_dtype).itemsize
    if itemsize >= 4:
        return 8
    if itemsize == 2:
        return 16   # bf16 packs 2 rows / sublane
    return 32       # int8 / fp8


def _pick_tile(dim, cands, max_waste_frac=1.0 / 16.0):
    """Largest candidate with small padding waste, else the min-waste one."""
    for c in cands:  # descending
        if _round_up(dim, c) - dim <= dim * max_waste_frac:
            return c
    return min(cands, key=lambda c: (_round_up(dim, c), -c))


def _choose_nk_tiles(N, K, compute_dtype, out_dtype):
    """tn / tk depend only on (N, K, dtypes, hw) so the padded weight caches."""
    in_b = jnp.dtype(compute_dtype).itemsize
    out_b = jnp.dtype(out_dtype).itemsize
    budget = _tile_budget_bytes()

    tn = 128 if N <= 128 else _pick_tile(N, [512, 384, 256, 128])
    tk = min(_round_up(K, 128), 2048)

    def footprint(tk_):
        return (2 * (_TM_MAX * tk_ + tk_ * tn) * in_b   # double-buffered x & W
                + _TM_MAX * tn * 4                       # f32 accumulator
                + 2 * _TM_MAX * tn * out_b)              # double-buffered output

    while tk > 256 and footprint(tk) > budget:
        tk //= 2
    return tn, tk


def _choose_tm(M, compute_dtype):
    align = _row_align(compute_dtype)
    if M <= _TM_MAX:
        return _round_up(M, align)
    return _pick_tile(M, [512, 448, 384, 320, 256])


# ----------------------------------------------------------------------------
# Weight / bias one-time preparation (hoisted out of the per-call path)
# ----------------------------------------------------------------------------

def _prep_weight(weight, compute_dtype, tn, tk):
    """(N, K) weight -> transposed, cast, padded (Kp, Np) for NN contraction."""
    N, K = weight.shape
    Kp, Np = _round_up(K, tk), _round_up(N, tn)
    w = jnp.asarray(weight).T.astype(compute_dtype)          # (K, N)
    if (Kp, Np) != (K, N):
        w = jnp.pad(w, ((0, Kp - K), (0, Np - N)))
    return w


def _prep_bias(bias, tn):
    N = bias.shape[0]
    Np = _round_up(N, tn)
    b = jnp.asarray(bias).reshape(1, N)
    if Np != N:
        b = jnp.pad(b, ((0, 0), (0, Np - N)))
    return b


# ----------------------------------------------------------------------------
# Kernels (NN contraction: x (tm, tk) @ w (tk, tn), f32 accumulator)
# ----------------------------------------------------------------------------

def _linear_bias_kernel(x_ref, w_ref, b_ref, o_ref, acc_ref):
    k = pl.program_id(2)

    # Fold bias into the accumulator init (saves an epilogue add).
    @pl.when(k == 0)
    def _():
        acc_ref[...] = jnp.broadcast_to(
            b_ref[...].astype(jnp.float32), acc_ref.shape
        )

    acc_ref[...] += jnp.dot(
        x_ref[...], w_ref[...], preferred_element_type=jnp.float32
    )

    @pl.when(k == pl.num_programs(2) - 1)
    def _():
        o_ref[...] = acc_ref[...].astype(o_ref.dtype)


def _linear_nobias_kernel(x_ref, w_ref, o_ref, acc_ref):
    k = pl.program_id(2)

    @pl.when(k == 0)
    def _():
        acc_ref[...] = jnp.zeros_like(acc_ref)

    acc_ref[...] += jnp.dot(
        x_ref[...], w_ref[...], preferred_element_type=jnp.float32
    )

    @pl.when(k == pl.num_programs(2) - 1)
    def _():
        o_ref[...] = acc_ref[...].astype(o_ref.dtype)


# ----------------------------------------------------------------------------
# pallas_call wrapper (weight/bias already prepared)
# ----------------------------------------------------------------------------

@functools.partial(
    jax.jit,
    static_argnames=("tm", "tn", "tk", "compute_dtype", "out_dtype", "n_out"),
)
def _linear_prepped(x2d, w_kn_p, b2d_p, *, tm, tn, tk, compute_dtype,
                    out_dtype, n_out):
    M, K = x2d.shape
    Kp, Np = w_kn_p.shape
    Mp = _round_up(M, tm)

    xp = x2d.astype(compute_dtype)
    if (Mp, Kp) != (M, K):
        xp = jnp.pad(xp, ((0, Mp - M), (0, Kp - K)))

    grid = (Mp // tm, Np // tn, Kp // tk)
    in_b = jnp.dtype(compute_dtype).itemsize
    out_b = jnp.dtype(out_dtype).itemsize

    # Account for re-streaming: x is read once per N block, W once per M block.
    bytes_accessed = (Mp * Kp * in_b * grid[1]
                      + Np * Kp * in_b * grid[0]
                      + Mp * Np * out_b)
    if b2d_p is not None:
        bytes_accessed += Np * jnp.dtype(b2d_p.dtype).itemsize * grid[0]
    cost = pl.CostEstimate(
        flops=2 * Mp * Np * Kp, transcendentals=0, bytes_accessed=bytes_accessed
    )

    vmem_limit = int(min((7 * _vmem_capacity_bytes()) // 10,
                         _tile_budget_bytes() + (16 << 20)))

    # TODO(synk): if an xprof trace shows exposed DMA at k-step boundaries,
    # add pipeline_mode=pl.Buffered(3) to the x/W specs and re-budget VMEM.
    x_spec = pl.BlockSpec((tm, tk), lambda i, j, k: (i, k))
    w_spec = pl.BlockSpec((tk, tn), lambda i, j, k: (k, j))   # NN layout
    if b2d_p is not None:
        kernel = _linear_bias_kernel
        in_specs = [x_spec, w_spec, pl.BlockSpec((1, tn), lambda i, j, k: (0, j))]
        args = (xp, w_kn_p, b2d_p)
    else:
        kernel = _linear_nobias_kernel
        in_specs = [x_spec, w_spec]
        args = (xp, w_kn_p)

    out2d = pl.pallas_call(
        kernel,
        out_shape=jax.ShapeDtypeStruct((Mp, Np), out_dtype),
        grid_spec=pltpu.PrefetchScalarGridSpec(
            num_scalar_prefetch=0,
            grid=grid,
            in_specs=in_specs,
            out_specs=pl.BlockSpec((tm, tn), lambda i, j, k: (i, j)),
            scratch_shapes=[pltpu.VMEM((tm, tn), jnp.float32)],
        ),
        compiler_params=pltpu.CompilerParams(
            dimension_semantics=("parallel", "parallel", "arbitrary"),
            vmem_limit_bytes=vmem_limit,
        ),
        cost_estimate=cost,
    )(*args)

    return out2d[:M, :n_out]


def _maybe_split_for_megacore(M, tm, Np, tn):
    """Guarantee >=2 blocks on a parallel axis so both v7x TCs get work."""
    if _round_up(M, tm) // tm == 1 and Np // tn == 1 and Np >= 256:
        return 128  # Np is a multiple of 128, so 128 always divides it
    return tn


# ----------------------------------------------------------------------------
# Public functional API
# ----------------------------------------------------------------------------

def pallas_linear(x, weight, bias=None, *, compute_dtype=jnp.bfloat16):
    """y = x @ weight.T + bias. One-off API (weight prepped per call);
    use PallasLinear for cached weight preparation."""
    N, K = weight.shape
    compute_dtype = jnp.dtype(x.dtype if compute_dtype is None else compute_dtype)
    tn, tk = _choose_nk_tiles(N, K, compute_dtype, jnp.dtype(x.dtype))
    w_p = _prep_weight(weight, compute_dtype, tn, tk)
    b_p = _prep_bias(bias, tn) if bias is not None else None

    orig_shape = x.shape
    x2d = x.reshape(-1, K)
    M = x2d.shape[0]
    tm = _choose_tm(M, compute_dtype)
    tn = _maybe_split_for_megacore(M, tm, w_p.shape[1], tn)

    out2d = _linear_prepped(
        x2d, w_p, b_p, tm=tm, tn=tn, tk=tk,
        compute_dtype=compute_dtype, out_dtype=jnp.dtype(x.dtype), n_out=N,
    )
    return out2d.reshape(*orig_shape[:-1], N)


# ----------------------------------------------------------------------------
# Module mirror of tensorrt_llm.layers.linear.Linear (tp_size=1 path)
# ----------------------------------------------------------------------------

class PallasLinear:
    """Mirror of tensorrt_llm.layers.linear.Linear (tp_size=1, no LoRA/fp8).

    compute_dtype=jnp.bfloat16 (default) casts x and W to bf16 for the MXU
    with f32 accumulation; pass compute_dtype=None to compute in the module
    dtype (opt-out path, exact f32 GEMM).
    """

    def __init__(self, in_features, out_features, bias=True, dtype=jnp.float32,
                 tp_size=1, gather_output=True, compute_dtype=jnp.bfloat16):
        self.in_features = in_features
        self.out_features = out_features // tp_size
        self.dtype = jnp.dtype(dtype)
        self.tp_size = tp_size
        self.gather_output = gather_output
        self.compute_dtype = jnp.dtype(dtype if compute_dtype is None
                                       else compute_dtype)

        # Deterministic synthetic parameters (module __init__ only defines shapes).
        kw, kb = jax.random.split(jax.random.PRNGKey(42))
        self.weight = (
            jax.random.normal(kw, (self.out_features, self.in_features),
                              jnp.float32) * 0.02
        ).astype(self.dtype)
        self.bias = None
        if bias:
            self.bias = (
                jax.random.normal(kb, (self.out_features,), jnp.float32) * 0.01
            ).astype(self.dtype)

        # One-time weight/bias preparation (transpose to (K, N), cast to the
        # compute dtype, pad to tile multiples) -- hoisted out of forward().
        self._tn, self._tk = _choose_nk_tiles(
            self.out_features, self.in_features, self.compute_dtype, self.dtype
        )
        self._w_prepped = _prep_weight(self.weight, self.compute_dtype,
                                       self._tn, self._tk)
        self._b_prepped = (_prep_bias(self.bias, self._tn)
                           if self.bias is not None else None)

        # TODO(synk): allgather over tp_group (tp_size>1), LoRA, fp8 gemm-plugin
        # (v7x fp8 weight path) and pad_lda strided-GEMM are not implemented.

    def forward(self, x):
        orig_shape = x.shape
        x2d = x.reshape(-1, self.in_features)
        M = x2d.shape[0]

        tm = _choose_tm(M, self.compute_dtype)
        tn = _maybe_split_for_megacore(M, tm, self._w_prepped.shape[1], self._tn)

        out2d = _linear_prepped(
            x2d, self._w_prepped, self._b_prepped,
            tm=tm, tn=tn, tk=self._tk,
            compute_dtype=self.compute_dtype,
            out_dtype=jnp.dtype(x.dtype),
            n_out=self.out_features,
        )
        return out2d.reshape(*orig_shape[:-1], self.out_features)

    __call__ = forward


# ----------------------------------------------------------------------------
# Self-test
# ----------------------------------------------------------------------------

if __name__ == "__main__":
    batch, seq, in_features, out_features = 2, 8, 128, 256

    key = jax.random.PRNGKey(0)
    x = jax.random.normal(key, (batch, seq, in_features), jnp.float32)

    # --- default bf16 compute path ---
    layer = PallasLinear(in_features, out_features, bias=True, dtype=jnp.float32)
    y = jax.block_until_ready(layer(x))
    assert y.shape == (batch, seq, out_features), y.shape

    y_ref = (
        jnp.einsum(
            "bsk,nk->bsn",
            x.astype(jnp.bfloat16),
            layer.weight.astype(jnp.bfloat16),
            preferred_element_type=jnp.float32,
        )
        + layer.bias
    ).astype(x.dtype)
    assert jnp.allclose(y, y_ref, atol=2e-3, rtol=2e-3), float(
        jnp.max(jnp.abs(y - y_ref))
    )

    # --- f32 opt-out path (exact module dtype GEMM) ---
    layer_f32 = PallasLinear(in_features, out_features, bias=True,
                             dtype=jnp.float32, compute_dtype=None)
    y32 = jax.block_until_ready(layer_f32(x))
    y32_ref = jnp.einsum("bsk,nk->bsn", x, layer_f32.weight) + layer_f32.bias
    assert jnp.allclose(y32, y32_ref, atol=1e-4, rtol=1e-4), float(
        jnp.max(jnp.abs(y32 - y32_ref))
    )

    # --- no-bias, unaligned shapes (exercises padding + megacore N split) ---
    layer_nb = PallasLinear(96, 200, bias=False, dtype=jnp.float32)
    x2 = jax.random.normal(jax.random.PRNGKey(1), (3, 5, 96), jnp.float32)
    y2 = jax.block_until_ready(layer_nb(x2))
    assert y2.shape == (3, 5, 200), y2.shape
    y2_ref = jnp.einsum(
        "bsk,nk->bsn",
        x2.astype(jnp.bfloat16),
        layer_nb.weight.astype(jnp.bfloat16),
        preferred_element_type=jnp.float32,
    ).astype(x2.dtype)
    assert jnp.allclose(y2, y2_ref, atol=2e-3, rtol=2e-3), float(
        jnp.max(jnp.abs(y2 - y2_ref))
    )

    print("KERNEL_OK")
</pallas_src>

<mosaic_0001>
module attributes {stable_mosaic.version = 11 : i64} {
  func.func @_linear_bias_kernel(%arg0: i32, %arg1: i32, %arg2: i32, %arg3: memref<16x128xbf16, #tpu.memory_space<vmem>>, %arg4: memref<128x128xbf16, #tpu.memory_space<vmem>>, %arg5: memref<1x128xf32, #tpu.memory_space<vmem>>, %arg6: memref<16x128xf32, #tpu.memory_space<vmem>>, %arg7: memref<16x128xf32, #tpu.memory_space<vmem>>) attributes {dimension_semantics = [#tpu.dimension_semantics<parallel>, #tpu.dimension_semantics<parallel>, #tpu.dimension_semantics<arbitrary>], iteration_bounds = array<i64: 1, 2, 1>, scalar_prefetch = 0 : i64, scratch_operands = 1 : i64, tpu.core_type = #tpu.core_type<tc>, window_params = [{transform_indices = @transform_0, window_bounds = array<i64: 16, 128>}, {transform_indices = @transform_1, window_bounds = array<i64: 128, 128>}, {transform_indices = @transform_2, window_bounds = array<i64: 1, 128>}, {transform_indices = @transform_3, window_bounds = array<i64: 16, 128>}]} {
    %c0_i32 = arith.constant 0 : i32
    %0 = arith.cmpi eq, %arg2, %c0_i32 : i32
    %1 = arith.extui %0 : i1 to i32
    %c0_i32_0 = arith.constant 0 : i32
    %2 = arith.cmpi ne, %1, %c0_i32_0 : i32
    scf.if %2 {
      %c0_10 = arith.constant 0 : index
      %c0_11 = arith.constant 0 : index
      %12 = vector.load %arg5[%c0_10, %c0_11] : memref<1x128xf32, #tpu.memory_space<vmem>>, vector<1x128xf32>
      %13 = vector.shape_cast %12 : vector<1x128xf32> to vector<1x128xf32>
      %14 = vector.broadcast %13 : vector<1x128xf32> to vector<16x128xf32>
      %c0_12 = arith.constant 0 : index
      %c0_13 = arith.constant 0 : index
      %15 = vector.load %arg7[%c0_12, %c0_13] : memref<16x128xf32, #tpu.memory_space<vmem>>, vector<16x128xf32>
      tpu.vector_store %arg7[%c0_12, %c0_13], %14 {strides = array<i32>} : memref<16x128xf32, #tpu.memory_space<vmem>>, vector<16x128xf32>,
    } else {
    }
    %c0 = arith.constant 0 : index
    %c0_1 = arith.constant 0 : index
    %3 = vector.load %arg7[%c0, %c0_1] : memref<16x128xf32, #tpu.memory_space<vmem>>, vector<16x128xf32>
    %c0_2 = arith.constant 0 : index
    %c0_3 = arith.constant 0 : index
    %4 = vector.load %arg3[%c0_2, %c0_3] : memref<16x128xbf16, #tpu.memory_space<vmem>>, vector<16x128xbf16>
    %c0_4 = arith.constant 0 : index
    %c0_5 = arith.constant 0 : index
    %5 = vector.load %arg4[%c0_4, %c0_5] : memref<128x128xbf16, #tpu.memory_space<vmem>>, vector<128x128xbf16>
    %cst = arith.constant dense<0.000000e+00> : vector<16x128xf32>
    %6 = tpu.matmul %4, %5, %cst {dimension_numbers = #tpu.dot_dimension_numbers<[1], [0], [0], [1], [0, 0, 1, 1], [], []>} : vector<16x128xbf16>, vector<128x128xbf16>, vector<16x128xf32> -> vector<16x128xf32>
    %7 = arith.addf %3, %6 : vector<16x128xf32>
    %c0_6 = arith.constant 0 : index
    %c0_7 = arith.constant 0 : index
    %8 = vector.load %arg7[%c0_6, %c0_7] : memref<16x128xf32, #tpu.memory_space<vmem>>, vector<16x128xf32>
    tpu.vector_store %arg7[%c0_6, %c0_7], %7 {strides = array<i32>} : memref<16x128xf32, #tpu.memory_space<vmem>>, vector<16x128xf32>,
    %c0_i32_8 = arith.constant 0 : i32
    %9 = arith.cmpi eq, %arg2, %c0_i32_8 : i32
    %10 = arith.extui %9 : i1 to i32
    %c0_i32_9 = arith.constant 0 : i32
    %11 = arith.cmpi ne, %10, %c0_i32_9 : i32
    scf.if %11 {
      %c0_10 = arith.constant 0 : index
      %c0_11 = arith.constant 0 : index
      %12 = vector.load %arg7[%c0_10, %c0_11] : memref<16x128xf32, #tpu.memory_space<vmem>>, vector<16x128xf32>
      %c0_12 = arith.constant 0 : index
      %c0_13 = arith.constant 0 : index
      %13 = vector.load %arg6[%c0_12, %c0_13] : memref<16x128xf32, #tpu.memory_space<vmem>>, vector<16x128xf32>
      tpu.vector_store %arg6[%c0_12, %c0_13], %12 {strides = array<i32>} : memref<16x128xf32, #tpu.memory_space<vmem>>, vector<16x128xf32>,
    } else {
    }
    return
  }
  func.func @transform_0(%arg0: i32, %arg1: i32, %arg2: i32) -> (i32, i32) {
    %c0_i32 = arith.constant 0 : i32
    return %arg0, %arg2 : i32, i32
  }
  func.func @transform_1(%arg0: i32, %arg1: i32, %arg2: i32) -> (i32, i32) {
    %c0_i32 = arith.constant 0 : i32
    return %arg2, %arg1 : i32, i32
  }
  func.func @transform_2(%arg0: i32, %arg1: i32, %arg2: i32) -> (i32, i32) {
    %c0_i32 = arith.constant 0 : i32
    %c0_i32_0 = arith.constant 0 : i32
    return %c0_i32, %arg1 : i32, i32
  }
  func.func @transform_3(%arg0: i32, %arg1: i32, %arg2: i32) -> (i32, i32) {
    %c0_i32 = arith.constant 0 : i32
    return %arg0, %arg1 : i32, i32
  }
}

</mosaic_0001>

<bundles_post_ra>
// kernel: _linear_prepped.1
= control target key start
LH: loop header
LB: loop body
LE: loop exit
PB: predicated region body
PF: predicated region fallthrough
CT: control target
= control target key end

     0   :  { %8 = vsyncpa [#allocation4], 0  ;;  %s904_s0 = inlined_call_operand.vmem [shape: bf16[16,128], index: 0, kind: input, shape index: {}]   ;;  %s905_s1 = inlined_call_operand.hbm [shape: bf16[128,256], index: 1, kind: input, shape index: {}]   ;;  %s906_s2 = inlined_call_operand.vmem [shape: f32[1,256], index: 2, kind: input, shape index: {}]   ;;  %s907_s3 = inlined_call_operand.hbm [shape: f32[16,256], index: 3, kind: output, shape index: {}]  }
   0x1   :  { %10 = vsyncpa [#allocation4 + $0x1], 0 }
   0x2   :  { %11 = vsyncpa [#allocation5], 0 }
   0x3   :  { %13 = vsyncpa [#allocation5 + $0x1], 0  ;;  %s775_s12 = smov 0   ;;  %s777_s13 = smov 0  }
   0x4   :  { %s779_s14 = smov 0   ;;  %s781_s15 = smov 0  }
   0x5   :  { %s783_s16 = smov 0   ;;  %s785_s17 = smov 0  }
   0x6 LB: > { %s507_s18 = sadd.s32 4294967295, %s747_s17   ;;  %s508_s19 = sadd.s32 4294967294, %s747_s17   ;;  %s747_s17 = sphi %s785_s17, %s19_s17   ;;  %s743_s16 = sphi %s783_s16, %s916_s16   ;;  %s739_s15 = sphi %s781_s15, %s915_s15   ;;  %s735_s14 = sphi %s779_s14, %s914_s14   ;;  %s731_s13 = sphi %s777_s13, %s913_s13   ;;  %s727_s12 = sphi %s775_s12, %s912_s12  }
   0x7   : > { %s34_s20 = sadd.s32 1, %s743_s16  ;;  %s75_s21 = sadd.s32 1, %s735_s14 }
   0x8   : > { %p36_p0 = scmp.ge.s32.totalorder %s34_s20, 2  ;;  %p82_p1 = scmp.ne.s32.totalorder %s735_s14, %s731_s13 }
   0x9   : > { %p83_p2 = scmp.eq.s32.totalorder %s747_s17, 0  ;;  %p88_p3 = scmp.ne.s32.totalorder %s731_s13, %s727_s12 }
   0xa   : > { %s918_s20 = smov (%p36_p0, %s34_s20), 0  ;;  %p89_p5 = scmp.eq.s32.totalorder %s507_s18, 0 }
   0xb   : > { %p816_p4 = por %p83_p2, %p82_p1  ;;  %s71_s23 = ssub.s32 %s743_s16, %s918_s20 }
   0xc   : > { %p140_p6 = scmp.eq.s32.totalorder %s507_s18, 1  ;;  %p73_p7 = scmp.eq.s32.totalorder %s71_s23, 0 }
   0xd   : > { %p822_p8 = por %p89_p5, %p88_p3  ;;  %p146_p10 = scmp.eq.s32.totalorder %s508_s19, 1 }
   0xe   : > { %p826_p9 = por %p140_p6, %p82_p1  ;;  %p511_p12 = scmp.ge.s32.totalorder %s747_s17, 2 }
   0xf   : > { %s831_s26 = scalar_select %p73_p7, %s735_s14, %s75_s21  }
  0x10   : > { %p833_p11 = por %p146_p10, %p88_p3  ;;  %p578_p13 = scmp.lt.s32.totalorder %s747_s17, 2 }
  0x11   : > { %s178_s28 = sand.u32 1, %s735_s14   ;;  %s513_s30 = sshll.u32 %s743_s16, 2 }
  0x12   : > { %s512_s29 = sshll.u32 %s178_s28, 6  ;;  %s189_s6 = scalar_lea.hbm %s905_s1, %s513_s30 }
  0x13   : > { %s182_s7 = scalar_lea.vmem [#allocation3], %s512_s29  ;;  %s190_s9 = sshll.u32 %s189_s6, 4  ;;  %s191_s9 = int_to_ptr.hbm [resolvable:$true] %s190_s9 }
  0x14   : > { %s192_s8 = sshll.u32 %s182_s7, 4  ;;  %p571_p0 = pnand %p578_p13, %p816_p4  ;;  %s193_s8 = int_to_ptr.vmem [resolvable:$true] %s192_s8 }
  0x15   : > { %s179_s10 = scalar_lea.sflag [#allocation4], %s178_s28  ;;  %s749_s11 = smov 128  }
  0x16   : > { %s750_s18 = smov 64   ;;  %s751_s19 = smov 4  }
  0x17   : > { %573 = dma.hbm_to_vmem [thread:$0]  (!%p571_p0), %s191_s9, 1024, %s193_s8, %s179_s10, %s749_s11, %s750_s18, %s751_s19  }
  0x18   : > { %p514_p1 = scmp.ge.s32.totalorder %s747_s17, 1  ;;  %p206_p2 = scmp.lt.s32.totalorder %s747_s17, 3 }
  0x1a   : > { %p207_p3 = pnand %p514_p1, %p206_p2 }
  0x1b   : > { %s849_s21 = sand.u32 (!%p207_p3), 1, %s731_s13  }
  0x1c   : > { %210 = sbr.rel (%p207_p3) target bundleno = 207 (0xcf), region = 32  ;;  %s515_s23 = sshll.u32 (!%p207_p3), %s849_s21, 6 }
  0x1d   : > { %s213_s29 = scalar_lea.sflag (!%p207_p3), [#allocation4], %s849_s21  ;;  %s216_s30 = scalar_lea.vmem (!%p207_p3), [#allocation3], %s515_s23 }
  0x21   : > { %718 = dma.done.wait (%p822_p8), %s213_s29, 1024  }
  0x22   : > { %720 = vsyncadd (%p822_p8), %s213_s29, 4294966272  ;;  %p261_p4 = scmp.lt.s32.totalorder %s739_s15, 1  ;;  %v565_v0 = vld [vmem:[%s216_s30 + $0x38] sm:$0xff]  ;;  %v564_v1 = vld [vmem:[%s216_s30 + $0x30] sm:$0xff]  ;;  %s516_s7 = sshll.u32 %s849_s21, 4 }
  0x23   : > { %349 = vmatpush.bf16.msra.mxu0 %v565_v0  ;;  %v563_v2 = vld [vmem:[%s216_s30 + $0x28] sm:$0xff]  ;;  %v562_v3 = vld [vmem:[%s216_s30 + $0x20] sm:$0xff]  ;;  %v561_v4 = vld [vmem:[%s216_s30 + $0x18] sm:$0xff]  ;;  %s554_s8 = sshll.u32 %s739_s15, 3  ;;  %s250_s18 = scalar_lea.vmem [#allocation6], %s516_s7 }
  0x24   : > { %s262_s22 = scalar_select %p261_p4, %s739_s15, 1  ;;  %v560_v5 = vld [vmem:[%s216_s30 + $0x10] sm:$0xff]  ;;  %v559_v6 = vld [vmem:[%s216_s30 + $0x8] sm:$0xff]  ;;  %v558_v7 = vld [vmem:[%s216_s30] sm:$0xff] }
  0x25   : > { %v557_v8 = vld [vmem:[%s904_s0] sm:$0xff]  ;;  %s388_s11 = scalar_lea.hbm %s907_s3, %s554_s8  ;;  %s389_s19 = sshll.u32 %s250_s18, 4  ;;  %s390_s19 = int_to_ptr.vmem [resolvable:$true] %s389_s19 }
  0x26   : > { %s263_s5 = scalar_lea.vmem %s906_s2, %s262_s22  ;;  %s391_s23 = sshll.u32 %s388_s11, 4  ;;  %s392_s23 = int_to_ptr.hbm [resolvable:$true] %s391_s23 }
  0x27   : > { %350 = vmatpush.bf16.msra.mxu0 %v564_v1  ;;  %v634_v9 = vld [vmem:[%s263_s5] ss:$0 sm:$0xff]  ;;  %s375_s29 = scalar_lea.sflag [#allocation5], %s849_s21  ;;  %s679_s30 = sshra.s32 %s392_s23, 4  ;;  %s680_s30 = int_to_ptr.hbm [resolvable:$true] %s679_s30 }
  0x28   : > { %s681_s15 = scalar_lea.hbm %s680_s30, 16  ;;  %s685_s4 = scalar_lea.hbm %s907_s3, 32 }
  0x29   : > { %p682_p5 = scmp.ne.s32.totalorder %s680_s30, %s681_s15  ;;  %p686_p8 = scmp.lt.s32.totalorder %s680_s30, %s907_s3 }
  0x2a   : > { %p687_p10 = scmp.lt.s32.totalorder %s685_s4, %s681_s15 }
  0x2b   : > { %351 = vmatpush.bf16.msra.mxu0 %v563_v2  ;;  %p683_p6 = pnand %p682_p5, %p826_p9 }
  0x2c   : > { %p688_p13 = por %p687_p10, %p686_p8 }
  0x2d   : > { %p684_p7 = pneg %p683_p6 }
  0x2f   : > { %352 = vmatpush.bf16.msra.mxu0 %v562_v3  ;;  %p689_p0 = pnand %p688_p13, %p684_p7 }
  0x33   : > { %353 = vmatpush.bf16.msra.mxu0 %v561_v4 }
  0x37   : > { %354 = vmatpush.bf16.msra.mxu0 %v560_v5 }
  0x3b   : > { %355 = vmatpush.bf16.msra.mxu0 %v559_v6 }
  0x3f   : > { %356 = vmatpush.bf16.msra.mxu0 %v558_v7 }
  0x42   : > { %357 = vmatmul.bf16.vlgmr.msra.gmra.mxu0 %v557_v8 }
  0xbf   : > { %v358_v10 = vpop.f32.mrf.mxu0 }
  0xc0   : > { %v363_v11 = vadd.f32 %v634_v9, %v358_v10 }
  0xc2   : > { %372 = vst [vmem:[%s250_s18] sm:$0xff] %v363_v11 }
  0xc7   : > { %v360_v12 = vpop.f32.mrf.mxu0 }
  0xc8   : > { %v364_v13 = vadd.f32 %v634_v9, %v360_v12 }
  0xca   : > { %373 = vst [vmem:[%s250_s18 + $0x8] sm:$0xff] %v364_v13 }
  0xcb   : > { %692 = shalt.err (!%p689_p0)
}
  0xcc   : > { %s752_s21 = smov 128   ;;  %s753_s6 = smov 256  }
  0xcd   : > { %s754_s7 = smov 8  }
  0xce   : > { %568 = dma.vmem_to_hbm [thread:$0]  (%p826_p9), %s390_s19, 256, %s392_s23, %s375_s29, %s752_s21, %s753_s6, %s754_s7  }
  0xcf PF: > { %s406_s8 = sand.u32 1, %s727_s12   ;;  %p575_p1 = pnand %p511_p12, %p833_p11 }
  0xd0   : > { %s407_s9 = scalar_lea.sflag [#allocation5], %s406_s8 }
  0xd1   : > { %p576_p2 = pneg %p575_p1 }
  0xd3   : > { %722 = dma.done.wait (%p576_p2), %s407_s9, 256  }
  0xd4   : > { %724 = vsyncadd (%p576_p2), %s407_s9, 4294967040  ;;  %s19_s17 = sadd.s32 1, %s747_s17   ;;  %s912_s12 = smov %s731_s13 }
  0xd5   : > { %p16_p3 = scmp.ge.s32.totalorder %s19_s17, 4   ;;  %s913_s13 = smov %s735_s14 }
  0xd6   : > { %s914_s14 = smov %s831_s26  ;;  %s915_s15 = smov %s743_s16 }
  0xd7   : > { %s916_s16 = smov %s918_s20  ;;  %18 = sbr.rel (!%p16_p3) target bundleno = 6 (0x6), region = 91 }
  0xdc   :  { %413 = vsyncpa [#allocation4], 1 }
  0xdd   :  { %415 = vsyncpa [#allocation4 + $0x1], 1 }
  0xde   :  { %416 = vsyncpa [#allocation5], 1 }
  0xdf   :  { %418 = vsyncpa [#allocation5 + $0x1], 1 }

</bundles_post_ra>
